<compile_context>
chip_gen: v6e
topology: v6e:2x2x1
jax: 0.10.0
libtpu: 0.0.40
codegen_flags: <defaults>
</compile_context>

<pallas_src>
import functools

import jax
import jax.numpy as jnp
from jax.experimental import pallas as pl
from jax.experimental.pallas import tpu as pltpu


# --------------------------------- helpers -----------------------------------

def _round_up(x, m):
    return ((x + m - 1) // m) * m


def _vmem_limit_bytes():
    # Never request the full physical VMEM (v7x TC = 64 MiB); leave headroom
    # for compiler scratch and double buffering (review #7/#8).
    try:
        cap = pltpu.get_tpu_info().vmem_capacity_bytes
    except Exception:
        cap = 64 * 1024 * 1024          # conservative fallback (v7x-sized)
    return int(cap) * 3 // 4


def _cpad_for(cout):
    # Lane-dense output channels. Deep layers get 256-wide tiles so the
    # 256-wide v6e/v7x MXU is filled (review #9); shallow layers use 128.
    if cout >= 256:
        return _round_up(cout, 256)
    return 128


# --------------------------- packed-tap kernel --------------------------------

def _packed_conv_kernel(x_ref, w_ref, shift_ref, o_ref, *, apply_act,
                        negative_slope):
    """One (tile_m, Kpad) @ (Kpad, Cpad) MXU matmul; BN shift + LeakyReLU fused.

    x_ref     : (1, tile_m, Kpad)  bf16  im2col patches (kh*kw taps folded into K)
    w_ref     : (Kpad, Cpad)       bf16  BN-scale-folded weights (grid-invariant)
    shift_ref : (1, Cpad)          f32   BN shift or conv bias
    o_ref     : (1, tile_m, Cpad)  bf16  lane-dense output tile
    """
    y = jnp.dot(x_ref[0], w_ref[...], preferred_element_type=jnp.float32)
    y = y + shift_ref[...]
    if apply_act:
        y = jnp.where(y >= 0, y, negative_slope * y)
    o_ref[0] = y.astype(o_ref.dtype)


# --------------------------- shifted-tap kernel -------------------------------

def _shifted_conv_kernel(x_ref, w_ref, shift_ref, o_ref, acc_ref, *, kh, kw,
                         wrow, m_wide, apply_act, negative_slope):
    """Deep (large Cin) stride-1 layers: kh*kw shifted matmuls, in-place f32 acc.

    x_ref     : (1, R, Cin)         bf16  padded NHWC image, rows flattened
    w_ref     : (kh*kw, Cin, Cpad)  bf16  per-tap weight slices (BN scale folded)
    shift_ref : (1, Cpad)           f32
    o_ref     : (1, M_wide, Cpad)   bf16  "wide" rows (Hout x aligned width)
    acc_ref   : (M_wide, Cpad)      f32   VMEM scratch accumulator (review #4)
    """
    for dy in range(kh):
        for dx in range(kw):
            off = dy * wrow + dx                       # static; wrow % 8 == 0
            rows = x_ref[0, pl.ds(off, m_wide), :]     # (M_wide, Cin)
            contrib = jnp.dot(rows, w_ref[dy * kw + dx],
                              preferred_element_type=jnp.float32)
            if dy == 0 and dx == 0:
                acc_ref[...] = contrib                 # first tap initializes
            else:
                acc_ref[...] += contrib
    y = acc_ref[...] + shift_ref[...]
    if apply_act:
        y = jnp.where(y >= 0, y, negative_slope * y)
    o_ref[0] = y.astype(o_ref.dtype)


# -------------------------------- wrapper -------------------------------------

def cnn_block_forward(x_nchw, params, *, batchnorm_activation=True,
                      stride=1, padding=1, eps=1e-5, negative_slope=0.1):
    """Forward pass equivalent to CNNBlock.forward (BatchNorm in inference mode)."""
    weight = params["weight"]                       # (Cout, Cin, kh, kw)
    cout, cin, kh, kw = weight.shape
    n, cin_x, h, w = x_nchw.shape
    assert cin_x == cin

    hp, wp = h + 2 * padding, w + 2 * padding
    hout = (hp - kh) // stride + 1
    wout = (wp - kw) // stride + 1
    cpad = _cpad_for(cout)

    # ---- fold BatchNorm (running stats) into a per-channel scale + shift ----
    w_f32 = weight.astype(jnp.float32)
    if batchnorm_activation:
        gamma = params["gamma"].astype(jnp.float32)
        beta = params["beta"].astype(jnp.float32)
        mean = params["running_mean"].astype(jnp.float32)
        var = params["running_var"].astype(jnp.float32)
        scale = gamma * jax.lax.rsqrt(var + eps)                 # (Cout,)
        shift = beta - mean * scale                              # (Cout,)
        w_f32 = w_f32 * scale[:, None, None, None]               # fold BN scale
    else:
        shift = params["bias"].astype(jnp.float32)
    shift = jnp.pad(shift, (0, cpad - cout)).reshape(1, cpad).astype(jnp.float32)

    x_nhwc = jnp.transpose(x_nchw, (0, 2, 3, 1))
    x_pad = jnp.pad(x_nhwc, ((0, 0), (padding, padding), (padding, padding), (0, 0)))

    k_full = kh * kw * cin
    use_packed = (k_full <= 256) or (stride > 1)

    compiler_params = pltpu.CompilerParams(
        dimension_semantics=(("parallel", "parallel") if use_packed
                             else ("parallel",)),
        vmem_limit_bytes=_vmem_limit_bytes())

    flops = 2 * n * hout * wout * kh * kw * cin * cout           # real, unpadded

    if use_packed:
        # -------- packed path: taps + Cin folded into the contraction dim ----
        taps = [x_pad[:, dy:dy + stride * hout:stride,
                      dx:dx + stride * wout:stride, :]
                for dy in range(kh) for dx in range(kw)]
        patches = jnp.concatenate(taps, axis=-1)        # (N, Hout, Wout, kh*kw*Cin)
        m = hout * wout
        kpad = _round_up(k_full, 128)                   # lane-dense input (#2)

        # Row-tile size: big blocks, but keep double-buffered blocks + resident
        # weights well under the VMEM budget.
        budget = 24 * 1024 * 1024
        tm = min(1024, _round_up(m, 8))
        while tm > 8 and 4 * tm * (kpad + cpad) + 2 * kpad * cpad > budget:
            tm = _round_up(tm // 2, 8)
        mpad = _round_up(m, tm)

        patches = patches.reshape(n, m, k_full)
        patches = jnp.pad(patches, ((0, 0), (0, mpad - m), (0, kpad - k_full)))
        patches = patches.astype(jnp.bfloat16)

        # (Cout,Cin,kh,kw) -> (kh,kw,Cin,Cout) -> (K, Cout), padded, bf16.
        w_mat = jnp.transpose(w_f32, (2, 3, 1, 0)).reshape(k_full, cout)
        w_mat = jnp.pad(w_mat, ((0, kpad - k_full), (0, cpad - cout)))
        w_mat = w_mat.astype(jnp.bfloat16)

        bytes_accessed = (patches.size * 2 + w_mat.size * 2 + shift.size * 4
                          + n * m * cout * 2)
        kernel = functools.partial(_packed_conv_kernel,
                                   apply_act=batchnorm_activation,
                                   negative_slope=negative_slope)
        # TODO(synk): try pipeline_mode=pl.Buffered(3) on the patches BlockSpec
        # once measured; skipped here to keep the pipeline at the default depth.
        out = pl.pallas_call(
            kernel,
            out_shape=jax.ShapeDtypeStruct((n, mpad, cpad), jnp.bfloat16),
            grid=(n, mpad // tm),
            in_specs=[
                pl.BlockSpec((1, tm, kpad), lambda b, i: (b, i, 0)),
                pl.BlockSpec((kpad, cpad), lambda b, i: (0, 0)),   # resident
                pl.BlockSpec((1, cpad), lambda b, i: (0, 0)),      # resident
            ],
            out_specs=pl.BlockSpec((1, tm, cpad), lambda b, i: (b, i, 0)),
            compiler_params=compiler_params,
            cost_estimate=pl.CostEstimate(flops=flops, transcendentals=0,
                                          bytes_accessed=bytes_accessed),
        )(patches, w_mat, shift)
        out = out[:, :m, :cout].reshape(n, hout, wout, cout)       # still bf16

    else:
        # -------- shifted path: deep stride-1 layers, single input copy ------
        assert stride == 1, "stride > 1 layers are routed to the packed path"
        wrow = _round_up(wp, 8)                 # sublane-aligned row stride (#10)
        x_al = jnp.pad(x_pad, ((0, 0), (0, 0), (0, wrow - wp), (0, 0)))
        x_flat = x_al.reshape(n, hp * wrow, cin)

        m_wide = hout * wrow                    # one "wide" row per padded column
        off_max = (kh - 1) * wrow + (kw - 1)
        rows_needed = off_max + m_wide
        extra = max(0, rows_needed - hp * wrow)
        if extra:
            x_flat = jnp.pad(x_flat, ((0, 0), (0, extra), (0, 0)))
        r_rows = hp * wrow + extra
        x_flat = x_flat.astype(jnp.bfloat16)

        w_taps = jnp.transpose(w_f32, (2, 3, 1, 0)).reshape(kh * kw, cin, cout)
        w_taps = jnp.pad(w_taps, ((0, 0), (0, 0), (0, cpad - cout)))
        w_taps = w_taps.astype(jnp.bfloat16)

        bytes_accessed = (x_flat.size * 2 + w_taps.size * 2 + shift.size * 4
                          + n * hout * wout * cout * 2)
        kernel = functools.partial(_shifted_conv_kernel, kh=kh, kw=kw,
                                   wrow=wrow, m_wide=m_wide,
                                   apply_act=batchnorm_activation,
                                   negative_slope=negative_slope)
        out_wide = pl.pallas_call(
            kernel,
            out_shape=jax.ShapeDtypeStruct((n, m_wide, cpad), jnp.bfloat16),
            grid=(n,),
            in_specs=[
                pl.BlockSpec((1, r_rows, cin), lambda b: (b, 0, 0)),
                pl.BlockSpec((kh * kw, cin, cpad), lambda b: (0, 0, 0)),
                pl.BlockSpec((1, cpad), lambda b: (0, 0)),
            ],
            out_specs=pl.BlockSpec((1, m_wide, cpad), lambda b: (b, 0, 0)),
            scratch_shapes=[pltpu.VMEM((m_wide, cpad), jnp.float32)],
            compiler_params=compiler_params,
            cost_estimate=pl.CostEstimate(flops=flops, transcendentals=0,
                                          bytes_accessed=bytes_accessed),
        )(x_flat, w_taps, shift)
        out = out_wide.reshape(n, hout, wrow, cpad)[:, :, :wout, :cout]  # bf16

    out_nchw = jnp.transpose(out, (0, 3, 1, 2))           # slice before transpose
    return out_nchw.astype(x_nchw.dtype)


# ------------------------------ reference (check) -----------------------------

def _reference(x_nchw, params, *, batchnorm_activation, stride, padding,
               eps=1e-5, negative_slope=0.1):
    w = params["weight"]
    out = jax.lax.conv_general_dilated(
        x_nchw, w, window_strides=(stride, stride),
        padding=[(padding, padding), (padding, padding)],
        dimension_numbers=("NCHW", "OIHW", "NCHW"))
    if batchnorm_activation:
        g = params["gamma"][None, :, None, None]
        b = params["beta"][None, :, None, None]
        mu = params["running_mean"][None, :, None, None]
        var = params["running_var"][None, :, None, None]
        out = (out - mu) / jnp.sqrt(var + eps) * g + b
        out = jnp.where(out >= 0, out, negative_slope * out)
    else:
        out = out + params["bias"][None, :, None, None]
    return out


# ----------------------------------- main --------------------------------------

if __name__ == "__main__":
    key = jax.random.PRNGKey(0)

    def make_params(k, cout, cin, kh, kw):
        ks = jax.random.split(k, 6)
        return {
            "weight": 0.1 * jax.random.normal(ks[0], (cout, cin, kh, kw), jnp.float32),
            "gamma": 1.0 + 0.1 * jax.random.normal(ks[1], (cout,), jnp.float32),
            "beta": 0.1 * jax.random.normal(ks[2], (cout,), jnp.float32),
            "running_mean": 0.1 * jax.random.normal(ks[3], (cout,), jnp.float32),
            "running_var": jnp.abs(1.0 + 0.1 * jax.random.normal(ks[4], (cout,), jnp.float32)),
            "bias": 0.1 * jax.random.normal(ks[5], (cout,), jnp.float32),
        }

    def check(name, x, params, **kw):
        out = jax.block_until_ready(cnn_block_forward(x, params, **kw))
        ref = _reference(x, params, **kw)
        assert out.shape == ref.shape, (name, out.shape, ref.shape)
        err = float(jnp.max(jnp.abs(out - ref)))
        assert jnp.allclose(out, ref, atol=5e-2, rtol=5e-2), (name, err)

    k0, k1, k2, k3 = jax.random.split(key, 4)

    # 1) Shallow YOLOv3-style block (packed path): Conv(4->8, k3, s1, p1)+BN+LeakyReLU
    x = jax.random.normal(k0, (2, 4, 16, 16), dtype=jnp.float32)
    p = make_params(k1, 8, 4, 3, 3)
    check("packed_bn", x, p, batchnorm_activation=True, stride=1, padding=1)

    # 2) Conv-only path (bias, no BN / activation)
    check("packed_conv_only", x, p, batchnorm_activation=False, stride=1, padding=1)

    # 3) Stride-2 downsampling block (packed path, no wide-row waste)
    check("packed_stride2", x, p, batchnorm_activation=True, stride=2, padding=1)

    # 4) Deeper block (shifted-tap path, kh*kw*Cin > 256): Conv(32->16, k3, s1, p1)
    x2 = jax.random.normal(k2, (2, 32, 8, 8), dtype=jnp.float32)
    p2 = make_params(k3, 16, 32, 3, 3)
    check("shifted_bn", x2, p2, batchnorm_activation=True, stride=1, padding=1)

    print("KERNEL_OK")
</pallas_src>

<mosaic_0001>
module attributes {stable_mosaic.version = 11 : i64} {
  func.func @_packed_conv_kernel(%arg0: i32, %arg1: i32, %arg2: memref<1x256x128xbf16, #tpu.memory_space<vmem>>, %arg3: memref<128x128xbf16, #tpu.memory_space<vmem>>, %arg4: memref<1x128xf32, #tpu.memory_space<vmem>>, %arg5: memref<1x256x128xbf16, #tpu.memory_space<vmem>>) attributes {dimension_semantics = [#tpu.dimension_semantics<parallel>, #tpu.dimension_semantics<parallel>], iteration_bounds = array<i64: 2, 1>, scalar_prefetch = 0 : i64, scratch_operands = 0 : i64, tpu.core_type = #tpu.core_type<tc>, window_params = [{transform_indices = @transform_0, window_bounds = array<i64: 1, 256, 128>}, {pipeline_mode = #tpu.pipeline_mode<synchronous>, transform_indices = @transform_1, window_bounds = array<i64: 128, 128>}, {pipeline_mode = #tpu.pipeline_mode<synchronous>, transform_indices = @transform_2, window_bounds = array<i64: 1, 128>}, {transform_indices = @transform_3, window_bounds = array<i64: 1, 256, 128>}]} {
    %c0 = arith.constant 0 : index
    %c0_0 = arith.constant 0 : index
    %c0_1 = arith.constant 0 : index
    %0 = vector.load %arg2[%c0, %c0_0, %c0_1] : memref<1x256x128xbf16, #tpu.memory_space<vmem>>, vector<1x256x128xbf16>
    %1 = vector.shape_cast %0 : vector<1x256x128xbf16> to vector<256x128xbf16>
    %c0_2 = arith.constant 0 : index
    %c0_3 = arith.constant 0 : index
    %2 = vector.load %arg3[%c0_2, %c0_3] : memref<128x128xbf16, #tpu.memory_space<vmem>>, vector<128x128xbf16>
    %cst = arith.constant dense<0.000000e+00> : vector<256x128xf32>
    %3 = tpu.matmul %1, %2, %cst {dimension_numbers = #tpu.dot_dimension_numbers<[1], [0], [0], [1], [0, 0, 1, 1], [], []>} : vector<256x128xbf16>, vector<128x128xbf16>, vector<256x128xf32> -> vector<256x128xf32>
    %c0_4 = arith.constant 0 : index
    %c0_5 = arith.constant 0 : index
    %4 = vector.load %arg4[%c0_4, %c0_5] : memref<1x128xf32, #tpu.memory_space<vmem>>, vector<1x128xf32>
    %5 = vector.broadcast %4 : vector<1x128xf32> to vector<256x128xf32>
    %6 = arith.addf %3, %5 : vector<256x128xf32>
    %cst_6 = arith.constant 0.000000e+00 : f32
    %7 = vector.broadcast %cst_6 : f32 to vector<256x128xf32>
    %8 = arith.cmpf oge, %6, %7 : vector<256x128xf32>
    %cst_7 = arith.constant 1.000000e-01 : f32
    %9 = vector.broadcast %cst_7 : f32 to vector<256x128xf32>
    %10 = arith.mulf %9, %6 : vector<256x128xf32>
    %11 = arith.select %8, %6, %10 : vector<256x128xi1>, vector<256x128xf32>
    %12 = arith.truncf %11 : vector<256x128xf32> to vector<256x128xbf16>
    %c0_8 = arith.constant 0 : index
    %c0_9 = arith.constant 0 : index
    %c0_10 = arith.constant 0 : index
    %13 = vector.load %arg5[%c0_8, %c0_9, %c0_10] : memref<1x256x128xbf16, #tpu.memory_space<vmem>>, vector<1x256x128xbf16>
    %14 = vector.shape_cast %13 : vector<1x256x128xbf16> to vector<256x128xbf16>
    %15 = vector.shape_cast %12 : vector<256x128xbf16> to vector<1x256x128xbf16>
    tpu.vector_store %arg5[%c0_8, %c0_9, %c0_10], %15 {strides = array<i32>} : memref<1x256x128xbf16, #tpu.memory_space<vmem>>, vector<1x256x128xbf16>,
    return
  }
  func.func @transform_0(%arg0: i32, %arg1: i32) -> (i32, i32, i32) {
    %c0_i32 = arith.constant 0 : i32
    %c0_i32_0 = arith.constant 0 : i32
    return %arg0, %arg1, %c0_i32 : i32, i32, i32
  }
  func.func @transform_1(%arg0: i32, %arg1: i32) -> (i32, i32) {
    %c0_i32 = arith.constant 0 : i32
    %c0_i32_0 = arith.constant 0 : i32
    %c0_i32_1 = arith.constant 0 : i32
    return %c0_i32, %c0_i32_0 : i32, i32
  }
  func.func @transform_2(%arg0: i32, %arg1: i32) -> (i32, i32) {
    %c0_i32 = arith.constant 0 : i32
    %c0_i32_0 = arith.constant 0 : i32
    %c0_i32_1 = arith.constant 0 : i32
    return %c0_i32, %c0_i32_0 : i32, i32
  }
  func.func @transform_3(%arg0: i32, %arg1: i32) -> (i32, i32, i32) {
    %c0_i32 = arith.constant 0 : i32
    %c0_i32_0 = arith.constant 0 : i32
    return %arg0, %arg1, %c0_i32 : i32, i32, i32
  }
}

</mosaic_0001>

<bundles_post_ra>
// kernel: tpu_custom_call.1
= control target key start
LH: loop header
LB: loop body
LE: loop exit
PB: predicated region body
PF: predicated region fallthrough
CT: control target
= control target key end

     0   :  { %8 = vsyncpa [#allocation3], 0  ;;  %s1783_s0 = inlined_call_operand.hbm [shape: bf16[2,256,128], index: 0, kind: input, shape index: {}]   ;;  %s1784_s1 = inlined_call_operand.hbm [shape: bf16[128,128], index: 1, kind: input, shape index: {}]   ;;  %s1785_s2 = inlined_call_operand.vmem [shape: f32[1,128], index: 2, kind: input, shape index: {}]   ;;  %s1786_s3 = inlined_call_operand.hbm [shape: bf16[2,256,128], index: 3, kind: output, shape index: {}]  }
   0x1   :  { %10 = vsyncpa [#allocation3 + $0x1], 0 }
   0x2   :  { %11 = vsyncpa [#allocation6], 0 }
   0x3   :  { %12 = vsyncpa [#allocation4], 0 }
   0x4   :  { %14 = vsyncpa [#allocation4 + $0x1], 0  ;;  %s1513_s12 = smov 0   ;;  %s1515_s13 = smov 0  }
   0x5   :  { %s1517_s14 = smov 0   ;;  %s1519_s15 = smov 0  }
   0x6   :  { %s1521_s16 = smov 0   ;;  %s1523_s17 = smov 0  }
   0x7 LB: > { %s954_s18 = sadd.s32 4294967295, %s1484_s17   ;;  %s955_s19 = sadd.s32 4294967294, %s1484_s17   ;;  %s1484_s17 = sphi %s1523_s17, %s20_s17   ;;  %s1480_s16 = sphi %s1521_s16, %s1808_s16   ;;  %s1476_s15 = sphi %s1519_s15, %s1807_s15   ;;  %s1472_s14 = sphi %s1517_s14, %s1806_s14   ;;  %s1468_s13 = sphi %s1515_s13, %s1805_s13   ;;  %s1464_s12 = sphi %s1513_s12, %s1804_s12  }
   0x8   : > { %p54_p0 = scmp.ne.s32.totalorder %s1468_s13, %s1464_s12  ;;  %p1547_p1 = scmp.eq.s32.totalorder %s954_s18, 0 }
   0x9   : > { %p1551_p2 = scmp.eq.s32.totalorder %s954_s18, 1  ;;  %p128_p3 = scmp.eq.s32.totalorder %s955_s19, 1 }
   0xa   : > { %p1557_p4 = por %p1547_p1, %p54_p0  ;;  %p956_p5 = scmp.ge.s32.totalorder %s1484_s17, 1 }
   0xb   : > { %p1562_p6 = por %p128_p3, %p54_p0  ;;  %p135_p7 = scmp.lt.s32.totalorder %s1484_s17, 3 }
   0xc   : > { %s1792_s22 = scalar_select %p1557_p4, 1, 0 }
   0xd   : > { %s1793_s23 = scalar_select %p1562_p6, 1, 0 }
   0xe   : > { %p1567_p8 = pnand %p956_p5, %p135_p7  ;;  %s1486_s25 = smov [#allocation5]  }
   0xf   : > { %s147_s26 = sshll.u32 %s1486_s25, 4  ;;  %s32_s28 = sadd.s32 1, %s1480_s16  ;;  %s148_s26 = int_to_ptr.vmem [resolvable:$true] %s147_s26 }
  0x10   : > { %p1253_p9 = pneg %p1567_p8  ;;  %s1357_s29 = scalar_lea.vmem %s148_s26, 1024 }
  0x11   : > { %p1358_p13 = scmp.ne.s32.totalorder %s148_s26, %s1357_s29  ;;  %p1365_p5 = scmp.lt.s32.totalorder %s148_s26, %s148_s26 }
  0x12   : > { %p1576_p11 = pnand %p1253_p9, %p1547_p1  ;;  %p1366_p7 = scmp.lt.s32.totalorder %s1357_s29, %s1357_s29 }
  0x14   : > { %p1348_p12 = pneg %p1576_p11  ;;  %p1367_p6 = por %p1366_p7, %p1365_p5 }
  0x16   : > { %p1360_p0 = pnand %p1358_p13, %p1348_p12 }
  0x18   : > { %p1361_p3 = pneg %p1360_p0 }
  0x1a   : > { %p1368_p4 = pnand %p1367_p6, %p1361_p3 }
  0x1c   : > { %1371 = shalt.err (!%p1368_p4)
}
  0x1d   : > { %s1788_s30 = smov 64   ;;  %s1789_s4 = smov 4  }
  0x1e   : > { %1256 = dma.hbm_to_vmem [thread:$0]  (!%p1576_p11), %s1784_s1, 1024, %s148_s26, [#allocation6], %s1788_s30, %s1788_s30, %s1789_s4  }
  0x1f   : > { %p34_p4 = scmp.ge.s32.totalorder %s32_s28, 2  ;;  %s41_s7 = sadd.s32 1, %s1472_s14 }
  0x20   : > { %p48_p6 = scmp.ne.s32.totalorder %s1472_s14, %s1468_s13  ;;  %p49_p9 = scmp.eq.s32.totalorder %s1484_s17, 0 }
  0x21   : > { %s1810_s28 = smov (%p34_p4, %s32_s28), 0  ;;  %p1266_p0 = scmp.lt.s32.totalorder %s1484_s17, 2 }
  0x22   : > { %p1597_p12 = por %p49_p9, %p48_p6  ;;  %p1603_p13 = por %p1551_p2, %p48_p6 }
  0x23   : > { %s36_s10 = ssub.s32 %s1480_s16, %s1810_s28  ;;  %s164_s11 = sand.u32 1, %s1472_s14  }
  0x24   : > { %p39_p11 = scmp.eq.s32.totalorder %s36_s10, 0  ;;  %s959_s18 = sshll.u32 %s164_s11, 7 }
  0x25   : > { %s1028_s25 = sshll.u32 %s1480_s16, 11  ;;  %s168_s5 = scalar_lea.vmem [#allocation2], %s959_s18 }
  0x26   : > { %s1612_s19 = scalar_select %p39_p11, %s1472_s14, %s41_s7  }
  0x27   : > { %s176_s29 = scalar_lea.hbm %s1783_s0, %s1028_s25  ;;  %s177_s6 = sshll.u32 %s168_s5, 4  ;;  %s178_s6 = int_to_ptr.vmem [resolvable:$true] %s177_s6 }
  0x28   : > { %p1620_p2 = pnand %p1266_p0, %p1597_p12  ;;  %s165_s30 = scalar_lea.sflag [#allocation3], %s164_s11 }
  0x29   : > { %s1385_s10 = scalar_lea.vmem %s178_s6, 2048  ;;  %s1489_s7 = smov [#allocation2]  }
  0x2a   : > { %p1374_p3 = pneg %p1620_p2  ;;  %p1386_p5 = scmp.ne.s32.totalorder %s178_s6, %s1385_s10 }
  0x2b   : > { %s1390_s4 = sshll.u32 %s1489_s7, 4  ;;  %s1391_s4 = int_to_ptr.vmem [resolvable:$false] %s1390_s4 }
  0x2c   : > { %p1388_p7 = pnand %p1386_p5, %p1374_p3  ;;  %s1392_s25 = scalar_lea.vmem %s1391_s4, 4096 }
  0x2d   : > { %p1393_p6 = scmp.lt.s32.totalorder %s178_s6, %s1391_s4  ;;  %p1394_p9 = scmp.lt.s32.totalorder %s1392_s25, %s1385_s10 }
  0x2e   : > { %p1389_p4 = pneg %p1388_p7 }
  0x2f   : > { %p1395_p11 = por %p1394_p9, %p1393_p6 }
  0x31   : > { %p1396_p10 = pnand %p1395_p11, %p1389_p4 }
  0x33   : > { %1399 = shalt.err (!%p1396_p10)
}
  0x34   : > { %s1799_s8 = smov 4   ;;  %s1800_s18 = smov 64  }
  0x35   : > { %1260 = dma.hbm_to_vmem [thread:$0]  (!%p1620_p2), %s176_s29, 2048, %s178_s6, %s165_s30, %s1800_s18, %s1800_s18, %s1799_s8  }
  0x36   : > { %189 = sbr.rel (%p1567_p8) target bundleno = 343 (0x157), region = 32  ;;  %s1634_s11 = sand.u32 (!%p1567_p8), 1, %s1468_s13  }
  0x37   : > { %s963_s4 = sshll.u32 (!%p1567_p8), %s1634_s11, 7  ;;  %s192_s26 = scalar_lea.sflag (!%p1567_p8), [#allocation3], %s1634_s11 }
  0x38   : > { %s1640_s27 = scalar_lea.vmem (!%p1567_p8), [#allocation2], %s963_s4  ;;  %p1801_p10 = scmp.ne.s32.totalorder (!%p1567_p8), %s1792_s22, 0 }
  0x3b   : > { %1451 = dma.done.wait (%p1801_p10), %s192_s26, 2048  }
  0x3c   : > { %1453 = vsyncadd (%p1801_p10), %s192_s26, 4294965248 }
  0x3d   : > { %1455 = dma.done.wait (%p1547_p1), [#allocation6], 1024  }
  0x3e   : > { %1457 = vsyncadd (%p1547_p1), [#allocation6], 4294966272  ;;  %v1322_v0 = vld [vmem:[#allocation5 + $0x38] sm:$0xff]   ;;  %v1323_v1 = vld [vmem:[#allocation5 + $0x30] sm:$0xff]   ;;  %s1684_s24 = scalar_lea.vmem [#allocation7], %s963_s4  ;;  %s1061_s30 = sshll.u32 %s1476_s15, 11 }
  0x3f   : > { %1181 = vmatprep.subr.bf16.mxu0 %v1322_v0  ;;  %1229 = vmatprep.subr.bf16.mxu1 %v1322_v0  ;;  %v1324_v2 = vld [vmem:[#allocation5 + $0x28] sm:$0xff]   ;;  %v1325_v3 = vld [vmem:[#allocation5 + $0x20] sm:$0xff]   ;;  %v1326_v6 = vld [vmem:[#allocation5 + $0x18] sm:$0xff]   ;;  %s857_s29 = sshll.u32 %s1684_s24, 4  ;;  %s1731_s21 = scalar_lea.hbm %s1786_s3, %s1061_s30  ;;  %s1733_s29 = int_to_ptr.vmem [resolvable:$true] %s857_s29 }
  0x40   : > { %1182 = vmatpush3.bf16.msra.mxu0 %v1322_v0  ;;  %1237 = vmatpush3.bf16.msra.mxu1 %v1322_v0  ;;  %v1330_v4 = vld [vmem:[%s1640_s27] sm:$0xff]   ;;  %v1327_v7 = vld [vmem:[#allocation5 + $0x10] sm:$0xff]   ;;  %v1328_v8 = vld [vmem:[#allocation5 + $0x8] sm:$0xff]   ;;  %s842_s15 = scalar_lea.sflag [#allocation4], %s1634_s11  ;;  %s1400_s10 = scalar_lea.vmem %s1733_s29, 2048 }
  0x41   : > { %1183 = vmatprep.subr.bf16.mxu0 %v1323_v1  ;;  %1230 = vmatprep.subr.bf16.mxu1 %v1323_v1  ;;  %v1331_v5 = vld [vmem:[%s1640_s27 + $0x40] sm:$0xff]   ;;  %v1332_v10 = vld [vmem:[%s1640_s27 + $0x8] sm:$0xff]   ;;  %v1334_v12 = vld [vmem:[%s1640_s27 + $0x10] sm:$0xff]   ;;  %p1401_p1 = scmp.ne.s32.totalorder %s1733_s29, %s1400_s10  ;;  %s1490_s7 = smov [#allocation7]  }
  0x42   : > { %1197 = vmatprep.mubr.bf16.mxu0 %v1330_v4  ;;  %1213 = vmatprep.mubr.bf16.mxu1 %v1331_v5  ;;  %v1329_v9 = vld [vmem:[#allocation5] sm:$0xff]   ;;  %v1333_v11 = vld [vmem:[%s1640_s27 + $0x48] sm:$0xff]   ;;  %v1335_v13 = vld [vmem:[%s1640_s27 + $0x50] sm:$0xff]   ;;  %s1404_s25 = sshll.u32 %s1490_s7, 4  ;;  %s1405_s25 = int_to_ptr.vmem [resolvable:$false] %s1404_s25 }
  0x43   : > { %v1336_v14 = vld [vmem:[%s1640_s27 + $0x18] sm:$0xff]   ;;  %v1338_v16 = vld [vmem:[%s1640_s27 + $0x20] sm:$0xff]   ;;  %v1340_v18 = vld [vmem:[%s1640_s27 + $0x28] sm:$0xff]   ;;  %p1402_p8 = pnand %p1401_p1, %p1603_p13  ;;  %s1406_s8 = scalar_lea.vmem %s1405_s25, 4096 }
  0x44   : > { %1184 = vmatpush3.bf16.msra.mxu0 %v1323_v1  ;;  %1238 = vmatpush3.bf16.msra.mxu1 %v1323_v1  ;;  %v1337_v15 = vld [vmem:[%s1640_s27 + $0x58] sm:$0xff]   ;;  %v1339_v17 = vld [vmem:[%s1640_s27 + $0x60] sm:$0xff]   ;;  %v1341_v19 = vld [vmem:[%s1640_s27 + $0x68] sm:$0xff]   ;;  %p1407_p0 = scmp.lt.s32.totalorder %s1733_s29, %s1405_s25  ;;  %p1408_p2 = scmp.lt.s32.totalorder %s1406_s8, %s1400_s10 }
  0x45   : > { %1185 = vmatprep.subr.bf16.mxu0 %v1324_v2  ;;  %1231 = vmatprep.subr.bf16.mxu1 %v1324_v2  ;;  %v1342_v20 = vld [vmem:[%s1640_s27 + $0x30] sm:$0xff]   ;;  %v1344_v22 = vld [vmem:[%s1640_s27 + $0x38] sm:$0xff]   ;;  %v1669_v24 = vld [vmem:[%s1785_s2] ss:$0 sm:$0xff]  ;;  %p1403_p12 = pneg %p1402_p8 }
  0x46   : > { %v1343_v21 = vld [vmem:[%s1640_s27 + $0x70] sm:$0xff]   ;;  %v1345_v23 = vld [vmem:[%s1640_s27 + $0x78] sm:$0xff]   ;;  %p1409_p3 = por %p1408_p2, %p1407_p0 }
  0x48   : > { %1186 = vmatpush3.bf16.msra.mxu0 %v1324_v2  ;;  %1239 = vmatpush3.bf16.msra.mxu1 %v1324_v2  ;;  %p1410_p5 = pnand %p1409_p3, %p1403_p12 }
  0x49   : > { %1187 = vmatprep.subr.bf16.mxu0 %v1325_v3  ;;  %1232 = vmatprep.subr.bf16.mxu1 %v1325_v3 }
  0x4c   : > { %1188 = vmatpush3.bf16.msra.mxu0 %v1325_v3  ;;  %1240 = vmatpush3.bf16.msra.mxu1 %v1325_v3 }
  0x4d   : > { %1189 = vmatprep.subr.bf16.mxu0 %v1326_v6  ;;  %1233 = vmatprep.subr.bf16.mxu1 %v1326_v6 }
  0x50   : > { %1190 = vmatpush3.bf16.msra.mxu0 %v1326_v6  ;;  %1241 = vmatpush3.bf16.msra.mxu1 %v1326_v6 }
  0x51   : > { %1191 = vmatprep.subr.bf16.mxu0 %v1327_v7  ;;  %1234 = vmatprep.subr.bf16.mxu1 %v1327_v7 }
  0x54   : > { %1192 = vmatpush3.bf16.msra.mxu0 %v1327_v7  ;;  %1242 = vmatpush3.bf16.msra.mxu1 %v1327_v7 }
  0x55   : > { %1193 = vmatprep.subr.bf16.mxu0 %v1328_v8  ;;  %1235 = vmatprep.subr.bf16.mxu1 %v1328_v8 }
  0x58   : > { %1194 = vmatpush3.bf16.msra.mxu0 %v1328_v8  ;;  %1243 = vmatpush3.bf16.msra.mxu1 %v1328_v8 }
  0x59   : > { %1195 = vmatprep.subr.bf16.mxu0 %v1329_v9  ;;  %1236 = vmatprep.subr.bf16.mxu1 %v1329_v9 }
  0x5c   : > { %1196 = vmatpush3.bf16.msra.mxu0 %v1329_v9  ;;  %1244 = vmatpush3.bf16.msra.mxu1 %v1329_v9 }
  0x5f   : > { %1198 = vmatmul.mubr.bf16.vlgmr.msra.gmra.mxu0 %v1332_v10  ;;  %1214 = vmatmul.mubr.bf16.vlgmr.msra.gmra.mxu1 %v1333_v11 }
  0x60   : > { %1201 = vmatprep.mubr.bf16.mxu0 %v1334_v12  ;;  %1217 = vmatprep.mubr.bf16.mxu1 %v1335_v13 }
  0x67   : > { %1202 = vmatmul.mubr.bf16.gmra.mxu0 %v1336_v14  ;;  %1218 = vmatmul.mubr.bf16.gmra.mxu1 %v1337_v15 }
  0x68   : > { %1205 = vmatprep.mubr.bf16.mxu0 %v1338_v16  ;;  %1221 = vmatprep.mubr.bf16.mxu1 %v1339_v17 }
  0x6f   : > { %1206 = vmatmul.mubr.bf16.gmra.mxu0 %v1340_v18  ;;  %1222 = vmatmul.mubr.bf16.gmra.mxu1 %v1341_v19 }
  0x70   : > { %1209 = vmatprep.mubr.bf16.mxu0 %v1342_v20  ;;  %1225 = vmatprep.mubr.bf16.mxu1 %v1343_v21 }
  0x77   : > { %1210 = vmatmul.mubr.bf16.gmra.mxu0 %v1344_v22  ;;  %1226 = vmatmul.mubr.bf16.gmra.mxu1 %v1345_v23 }
 0x11f   : > { %v1199_v25 = vpop.f32.mrf.mxu0  ;;  %v1215_v26 = vpop.f32.mrf.mxu1 }
 0x120   : > { %v467_v27 = vadd.f32 %v1199_v25, %v1669_v24  ;;  %v531_v28 = vadd.f32 %v1215_v26, %v1669_v24 }
 0x121   : > { %v458_v29 = vpop.f32.mrf.mxu0  ;;  %v522_v30 = vpop.f32.mrf.mxu1 }
 0x122   : > { %vm587_vm0 = vcmp.ge.f32.partialorder %v467_v27, 0.0  ;;  %v619_v31 = vmul.f32 0.1, %v467_v27  ;;  %vm603_vm1 = vcmp.ge.f32.partialorder %v531_v28, 0.0  ;;  %v635_v32 = vmul.f32 0.1, %v531_v28 }
 0x123   : > { %v459_v33 = vadd.f32 %v1669_v24, %v458_v29  ;;  %v523_v34 = vadd.f32 %v1669_v24, %v522_v30  ;;  %v1200_v35 = vpop.f32.mrf.mxu0  ;;  %v1216_v36 = vpop.f32.mrf.mxu1 }
 0x124   : > { %v651_v37 = vsel %vm587_vm0, %v467_v27, %v619_v31  ;;  %v470_v38 = vadd.f32 %v1200_v35, %v1669_v24  ;;  %v534_v39 = vadd.f32 %v1216_v36, %v1669_v24  ;;  %v667_v40 = vsel %vm603_vm1, %v531_v28, %v635_v32 }
 0x125   : > { %vm585_vm2 = vcmp.ge.f32.partialorder %v459_v33, 0.0  ;;  %v617_v41 = vmul.f32 0.1, %v459_v33  ;;  %vm601_vm3 = vcmp.ge.f32.partialorder %v523_v34, 0.0  ;;  %v461_v42 = vpop.f32.mrf.mxu0  ;;  %v525_v43 = vpop.f32.mrf.mxu1  ;;  %v633_v47 = vmul.f32 0.1, %v523_v34 }
 0x126   : > { %vm588_vm4 = vcmp.ge.f32.partialorder %v470_v38, 0.0  ;;  %v620_v44 = vmul.f32 0.1, %v470_v38  ;;  %vm604_vm5 = vcmp.ge.f32.partialorder %v534_v39, 0.0  ;;  %v636_v45 = vmul.f32 0.1, %v534_v39 }
 0x127   : > { %v649_v46 = vsel %vm585_vm2, %v459_v33, %v617_v41  ;;  %v462_v48 = vadd.f32 %v1669_v24, %v461_v42  ;;  %v526_v49 = vadd.f32 %v1669_v24, %v525_v43  ;;  %v1203_v50 = vpop.f32.mrf.mxu0  ;;  %v1219_v51 = vpop.f32.mrf.mxu1  ;;  %v665_v63 = vsel %vm601_vm3, %v523_v34, %v633_v47 }
 0x128   : > { %v652_v52 = vsel %vm588_vm4, %v470_v38, %v620_v44  ;;  %v668_v53 = vsel %vm604_vm5, %v534_v39, %v636_v45  ;;  %v483_v54 = vadd.f32 %v1203_v50, %v1669_v24  ;;  %v547_v55 = vadd.f32 %v1219_v51, %v1669_v24 }
 0x129   : > { %v1070_v56 = vpack.c.bf16 %v652_v52, %v651_v37  ;;  %v1110_v57 = vpack.c.bf16 %v668_v53, %v667_v40  ;;  %vm586_vm6 = vcmp.ge.f32.partialorder %v462_v48, 0.0  ;;  %v618_v58 = vmul.f32 0.1, %v462_v48  ;;  %v474_v59 = vpop.f32.mrf.mxu0  ;;  %v538_v60 = vpop.f32.mrf.mxu1 }
 0x12a   : > { %vm602_vm7 = vcmp.ge.f32.partialorder %v526_v49, 0.0  ;;  %v634_v61 = vmul.f32 0.1, %v526_v49  ;;  %vm591_vm8 = vcmp.ge.f32.partialorder %v483_v54, 0.0  ;;  %v623_v62 = vmul.f32 0.1, %v483_v54 }
 0x12b   : > { %1142 = vst [vmem:[%s1684_s24 + $0x8] sm:$0xff] %v1070_v56   ;;  %1150 = vst [vmem:[%s1684_s24 + $0x48] sm:$0xff] %v1110_v57   ;;  %v650_v0 = vsel %vm586_vm6, %v462_v48, %v618_v58  ;;  %v639_v1 = vmul.f32 0.1, %v547_v55  ;;  %v475_v2 = vadd.f32 %v1669_v24, %v474_v59  ;;  %v1204_v3 = vpop.f32.mrf.mxu0  ;;  %v1220_v4 = vpop.f32.mrf.mxu1  ;;  %vm607_vm9 = vcmp.ge.f32.partialorder %v547_v55, 0.0 }
 0x12c   : > { %v1065_v5 = vpack.c.bf16 %v650_v0, %v649_v46  ;;  %v666_v6 = vsel %vm602_vm7, %v526_v49, %v634_v61  ;;  %v539_v7 = vadd.f32 %v1669_v24, %v538_v60  ;;  %v655_v9 = vsel %vm591_vm8, %v483_v54, %v623_v62 }
 0x12d   : > { %v1105_v8 = vpack.c.bf16 %v666_v6, %v665_v63  ;;  %vm589_vm10 = vcmp.ge.f32.partialorder %v475_v2, 0.0  ;;  %v621_v10 = vmul.f32 0.1, %v475_v2  ;;  %v477_v11 = vpop.f32.mrf.mxu0  ;;  %v541_v12 = vpop.f32.mrf.mxu1  ;;  %v486_v14 = vadd.f32 %v1204_v3, %v1669_v24 }
 0x12e   : > { %1066 = vst [vmem:[%s1684_s24] sm:$0xff] %v1065_v5   ;;  %vm605_vm11 = vcmp.ge.f32.partialorder %v539_v7, 0.0  ;;  %v637_v13 = vmul.f32 0.1, %v539_v7  ;;  %v550_v15 = vadd.f32 %v1220_v4, %v1669_v24  ;;  %v671_v16 = vsel %vm607_vm9, %v547_v55, %v639_v1 }
 0x12f   : > { %1149 = vst [vmem:[%s1684_s24 + $0x40] sm:$0xff] %v1105_v8   ;;  %v653_v17 = vsel %vm589_vm10, %v475_v2, %v621_v10  ;;  %v478_v18 = vadd.f32 %v1669_v24, %v477_v11  ;;  %v542_v19 = vadd.f32 %v1669_v24, %v541_v12  ;;  %v1207_v20 = vpop.f32.mrf.mxu0  ;;  %v1223_v21 = vpop.f32.mrf.mxu1  ;;  %vm592_vm12 = vcmp.ge.f32.partialorder %v486_v14, 0.0 }
 0x130   : > { %v669_v22 = vsel %vm605_vm11, %v539_v7, %v637_v13  ;;  %v624_v23 = vmul.f32 0.1, %v486_v14  ;;  %vm608_vm13 = vcmp.ge.f32.partialorder %v550_v15, 0.0  ;;  %v640_v25 = vmul.f32 0.1, %v550_v15 }
 0x131   : > { %vm590_vm14 = vcmp.ge.f32.partialorder %v478_v18, 0.0  ;;  %v622_v26 = vmul.f32 0.1, %v478_v18  ;;  %vm606_vm15 = vcmp.ge.f32.partialorder %v542_v19, 0.0  ;;  %v490_v27 = vpop.f32.mrf.mxu0  ;;  %v554_v28 = vpop.f32.mrf.mxu1  ;;  %v638_v30 = vmul.f32 0.1, %v542_v19 }
 0x132   : > { %v656_v29 = vsel %vm592_vm12, %v486_v14, %v624_v23  ;;  %v499_v31 = vadd.f32 %v1207_v20, %v1669_v24  ;;  %v563_v32 = vadd.f32 %v1223_v21, %v1669_v24  ;;  %v672_v34 = vsel %vm608_vm13, %v550_v15, %v640_v25 }
 0x133   : > { %v1080_v33 = vpack.c.bf16 %v656_v29, %v655_v9  ;;  %v654_v35 = vsel %vm590_vm14, %v478_v18, %v622_v26  ;;  %v491_v36 = vadd.f32 %v1669_v24, %v490_v27  ;;  %v1208_v37 = vpop.f32.mrf.mxu0  ;;  %v1224_v38 = vpop.f32.mrf.mxu1  ;;  %v1120_v39 = vpack.c.bf16 %v672_v34, %v671_v16 }
 0x134   : > { %v1075_v40 = vpack.c.bf16 %v654_v35, %v653_v17  ;;  %v670_v41 = vsel %vm606_vm15, %v542_v19, %v638_v30  ;;  %vm595_vm0 = vcmp.ge.f32.partialorder %v499_v31, 0.0  ;;  %v627_v43 = vmul.f32 0.1, %v499_v31 }
 0x135   : > { %1144 = vst [vmem:[%s1684_s24 + $0x18] sm:$0xff] %v1080_v33   ;;  %v1115_v42 = vpack.c.bf16 %v670_v41, %v669_v22  ;;  %vm611_vm1 = vcmp.ge.f32.partialorder %v563_v32, 0.0  ;;  %v643_v44 = vmul.f32 0.1, %v563_v32  ;;  %v493_v45 = vpop.f32.mrf.mxu0  ;;  %v557_v46 = vpop.f32.mrf.mxu1  ;;  %1152 = vst [vmem:[%s1684_s24 + $0x58] sm:$0xff] %v1120_v39   ;;  %vm593_vm2 = vcmp.ge.f32.partialorder %v491_v36, 0.0 }
 0x136   : > { %1143 = vst [vmem:[%s1684_s24 + $0x10] sm:$0xff] %v1075_v40   ;;  %v625_v47 = vmul.f32 0.1, %v491_v36  ;;  %v555_v48 = vadd.f32 %v1669_v24, %v554_v28  ;;  %v502_v49 = vadd.f32 %v1208_v37, %v1669_v24  ;;  %v659_v50 = vsel %vm595_vm0, %v499_v31, %v627_v43 }
 0x137   : > { %1151 = vst [vmem:[%s1684_s24 + $0x50] sm:$0xff] %v1115_v42   ;;  %v566_v51 = vadd.f32 %v1224_v38, %v1669_v24  ;;  %v494_v52 = vadd.f32 %v1669_v24, %v493_v45  ;;  %v1211_v53 = vpop.f32.mrf.mxu0  ;;  %v1227_v54 = vpop.f32.mrf.mxu1  ;;  %v675_v55 = vsel %vm611_vm1, %v563_v32, %v643_v44  ;;  %v558_v63 = vadd.f32 %v1669_v24, %v557_v46 }
 0x138   : > { %v657_v56 = vsel %vm593_vm2, %v491_v36, %v625_v47  ;;  %vm609_vm3 = vcmp.ge.f32.partialorder %v555_v48, 0.0  ;;  %vm596_vm4 = vcmp.ge.f32.partialorder %v502_v49, 0.0  ;;  %v628_v57 = vmul.f32 0.1, %v502_v49 }
 0x139   : > { %vm612_vm5 = vcmp.ge.f32.partialorder %v566_v51, 0.0  ;;  %v644_v58 = vmul.f32 0.1, %v566_v51  ;;  %vm594_vm6 = vcmp.ge.f32.partialorder %v494_v52, 0.0  ;;  %v506_v59 = vpop.f32.mrf.mxu0  ;;  %v570_v60 = vpop.f32.mrf.mxu1  ;;  %v641_v61 = vmul.f32 0.1, %v555_v48 }
 0x13a   : > { %v626_v62 = vmul.f32 0.1, %v494_v52  ;;  %v515_v0 = vadd.f32 %v1211_v53, %v1669_v24  ;;  %v660_v1 = vsel %vm596_vm4, %v502_v49, %v628_v57  ;;  %v579_v3 = vadd.f32 %v1227_v54, %v1669_v24 }
 0x13b   : > { %v676_v2 = vsel %vm612_vm5, %v566_v51, %v644_v58  ;;  %v507_v4 = vadd.f32 %v1669_v24, %v506_v59  ;;  %v1212_v5 = vpop.f32.mrf.mxu0  ;;  %v1228_v6 = vpop.f32.mrf.mxu1  ;;  %v1090_v7 = vpack.c.bf16 %v660_v1, %v659_v50  ;;  %vm610_vm7 = vcmp.ge.f32.partialorder %v558_v63, 0.0 }
 0x13c   : > { %v1130_v8 = vpack.c.bf16 %v676_v2, %v675_v55  ;;  %v658_v9 = vsel %vm594_vm6, %v494_v52, %v626_v62  ;;  %v642_v11 = vmul.f32 0.1, %v558_v63  ;;  %v631_v12 = vmul.f32 0.1, %v515_v0 }
 0x13d   : > { %v1085_v10 = vpack.c.bf16 %v658_v9, %v657_v56  ;;  %v673_v13 = vsel %vm609_vm3, %v555_v48, %v641_v61  ;;  %1146 = vst [vmem:[%s1684_s24 + $0x28] sm:$0xff] %v1090_v7   ;;  %vm599_vm8 = vcmp.ge.f32.partialorder %v515_v0, 0.0  ;;  %v647_v15 = vmul.f32 0.1, %v579_v3  ;;  %v509_v18 = vpop.f32.mrf.mxu0  ;;  %v573_v19 = vpop.f32.mrf.mxu1 }
 0x13e   : > { %1154 = vst [vmem:[%s1684_s24 + $0x68] sm:$0xff] %v1130_v8   ;;  %v674_v14 = vsel %vm610_vm7, %v558_v63, %v642_v11  ;;  %v571_v16 = vadd.f32 %v1669_v24, %v570_v60  ;;  %v518_v17 = vadd.f32 %v1212_v5, %v1669_v24  ;;  %vm615_vm9 = vcmp.ge.f32.partialorder %v579_v3, 0.0 }
 0x13f   : > { %1145 = vst [vmem:[%s1684_s24 + $0x20] sm:$0xff] %v1085_v10   ;;  %v1125_v20 = vpack.c.bf16 %v674_v14, %v673_v13  ;;  %vm597_vm10 = vcmp.ge.f32.partialorder %v507_v4, 0.0  ;;  %v582_v21 = vadd.f32 %v1228_v6, %v1669_v24  ;;  %v663_v22 = vsel %vm599_vm8, %v515_v0, %v631_v12 }
 0x140   : > { %v629_v23 = vmul.f32 0.1, %v507_v4  ;;  %vm600_vm11 = vcmp.ge.f32.partialorder %v518_v17, 0.0  ;;  %v632_v25 = vmul.f32 0.1, %v518_v17  ;;  %v510_v27 = vadd.f32 %v1669_v24, %v509_v18 }
 0x141   : > { %1153 = vst [vmem:[%s1684_s24 + $0x60] sm:$0xff] %v1125_v20   ;;  %vm616_vm12 = vcmp.ge.f32.partialorder %v582_v21, 0.0  ;;  %v648_v26 = vmul.f32 0.1, %v582_v21  ;;  %v574_v28 = vadd.f32 %v1669_v24, %v573_v19  ;;  %v679_v29 = vsel %vm615_vm9, %v579_v3, %v647_v15 }
 0x142   : > { %vm613_vm13 = vcmp.ge.f32.partialorder %v571_v16, 0.0  ;;  %v645_v30 = vmul.f32 0.1, %v571_v16  ;;  %v664_v31 = vsel %vm600_vm11, %v518_v17, %v632_v25  ;;  %vm598_vm14 = vcmp.ge.f32.partialorder %v510_v27, 0.0 }
 0x143   : > { %v1100_v32 = vpack.c.bf16 %v664_v31, %v663_v22  ;;  %v680_v33 = vsel %vm616_vm12, %v582_v21, %v648_v26  ;;  %v630_v34 = vmul.f32 0.1, %v510_v27  ;;  %vm614_vm15 = vcmp.ge.f32.partialorder %v574_v28, 0.0 }
 0x144   : > { %v1140_v35 = vpack.c.bf16 %v680_v33, %v679_v29  ;;  %v646_v36 = vmul.f32 0.1, %v574_v28  ;;  %v661_v24 = vsel %vm597_vm10, %v507_v4, %v629_v23  ;;  %v677_v38 = vsel %vm613_vm13, %v571_v16, %v645_v30 }
 0x145   : > { %1148 = vst [vmem:[%s1684_s24 + $0x38] sm:$0xff] %v1100_v32   ;;  %v662_v37 = vsel %vm598_vm14, %v510_v27, %v630_v34 }
 0x146   : > { %1156 = vst [vmem:[%s1684_s24 + $0x78] sm:$0xff] %v1140_v35   ;;  %v1095_v39 = vpack.c.bf16 %v662_v37, %v661_v24  ;;  %v678_v40 = vsel %vm614_vm15, %v574_v28, %v646_v36 }
 0x147   : > { %v1135_v41 = vpack.c.bf16 %v678_v40, %v677_v38 }
 0x148   : > { %1147 = vst [vmem:[%s1684_s24 + $0x30] sm:$0xff] %v1095_v39  }
 0x149   : > { %1155 = vst [vmem:[%s1684_s24 + $0x70] sm:$0xff] %v1135_v41  }
 0x14a   : > { %1413 = shalt.err (!%p1410_p5)
}
 0x14b   : > { %s1414_s18 = scalar_lea.hbm %s1731_s21, 2048  ;;  %s1418_s27 = scalar_lea.hbm %s1786_s3, 4096 }
 0x14c   : > { %p1415_p7 = scmp.ne.s32.totalorder %s1731_s21, %s1414_s18  ;;  %p1419_p9 = scmp.lt.s32.totalorder %s1731_s21, %s1786_s3 }
 0x14d   : > { %p1420_p11 = scmp.lt.s32.totalorder %s1418_s27, %s1414_s18 }
 0x14e   : > { %p1416_p4 = pnand %p1415_p7, %p1603_p13 }
 0x14f   : > { %p1421_p10 = por %p1420_p11, %p1419_p9 }
 0x150   : > { %p1417_p6 = pneg %p1416_p4 }
 0x152   : > { %p1422_p1 = pnand %p1421_p10, %p1417_p6 }
 0x154   : > { %1425 = shalt.err (!%p1422_p1)
}
 0x155   : > { %s1491_s24 = smov 64   ;;  %s1492_s30 = smov 4  }
 0x156   : > { %1251 = dma.vmem_to_hbm [thread:$0]  (%p1603_p13), %s1733_s29, 2048, %s1731_s21, %s842_s15, %s1491_s24, %s1491_s24, %s1492_s30  }
 0x157 PF: > { %s872_s5 = sand.u32 1, %s1464_s12   ;;  %p1802_p8 = scmp.ne.s32.totalorder %s1793_s23, 0 }
 0x158   : > { %p1803_p12 = scmp.ge.s32.totalorder %s1484_s17, 2  ;;  %s873_s6 = scalar_lea.sflag [#allocation4], %s872_s5 }
 0x15a   : > { %p1262_p0 = pnand %p1803_p12, %p1802_p8 }
 0x15c   : > { %p1263_p2 = pneg %p1262_p0 }
 0x15e   : > { %1459 = dma.done.wait (%p1263_p2), %s873_s6, 2048  }
 0x15f   : > { %1461 = vsyncadd (%p1263_p2), %s873_s6, 4294965248  ;;  %s20_s17 = sadd.s32 1, %s1484_s17   ;;  %s1804_s12 = smov %s1468_s13 }
 0x160   : > { %p17_p3 = scmp.ge.s32.totalorder %s20_s17, 4   ;;  %s1805_s13 = smov %s1472_s14 }
 0x161   : > { %s1806_s14 = smov %s1612_s19  ;;  %s1807_s15 = smov %s1480_s16 }
 0x162   : > { %s1808_s16 = smov %s1810_s28  ;;  %19 = sbr.rel (!%p17_p3) target bundleno = 7 (0x7), region = 81 }
 0x167   :  { %878 = vsyncpa [#allocation3], 1 }
 0x168   :  { %880 = vsyncpa [#allocation3 + $0x1], 1 }
 0x169   :  { %881 = vsyncpa [#allocation6], 1 }
 0x16a   :  { %882 = vsyncpa [#allocation4], 1 }
 0x16b   :  { %884 = vsyncpa [#allocation4 + $0x1], 1 }

</bundles_post_ra>
